<compile_context>
chip_gen: v7x
topology: tpu7x:2x2x1
jax: 0.10.0
libtpu: 0.0.40
codegen_flags: <defaults>
</compile_context>

<pallas_src>
import functools
import math

import jax
import jax.numpy as jnp
from jax.experimental import pallas as pl
from jax.experimental.pallas import tpu as pltpu


def _round_up(x, m):
    return ((x + m - 1) // m) * m


def _vmem_capacity_bytes():
    """Per-core VMEM capacity; conservative (v7x-sized) fallback."""
    try:
        cap = getattr(pltpu.get_tpu_info(), "vmem_capacity_bytes", None)
        if cap:
            return int(cap)
    except Exception:
        pass
    return 64 << 20


def _vmem_limit_bytes(need_bytes, cap_bytes):
    # Generous headroom above the computed footprint, but never above 85% of
    # physical VMEM (leave room for compiler-internal scratch on v7x).
    hard_cap = int(cap_bytes * 0.85)
    want = int(need_bytes * 1.25) + (2 << 20)
    return int(min(max(want, 32 << 20), hard_cap))


# ---------------------------------------------------------------------------
# Path A: small-vocab fast path.  Embedding table resident in VMEM, gather via
# a one-hot matmul on the MXU.
#   * bf16 table  -> single bf16 dot (exact: one-hot is 0/1).
#   * f32 table   -> table is split into hi/mid/lo bf16 chunks in-kernel and
#                    gathered with 3 bf16 MXU passes (vs 6 for HIGHEST); the
#                    one-hot LHS is exact in bf16 so the sum reconstructs the
#                    f32 rows to ~1 ulp.
# ---------------------------------------------------------------------------
def _onehot_embed_kernel(ids_ref, emb_ref, out_ref, *, scale):
    tile = ids_ref.shape[0]
    vocab = emb_ref.shape[0]
    ids = ids_ref[...]                                        # (T, 1) int32
    iota = jax.lax.broadcasted_iota(jnp.int32, (tile, vocab), 1)
    onehot = (ids == iota).astype(jnp.bfloat16)               # (T, V) exact 0/1

    tbl = emb_ref[...]
    if tbl.dtype == jnp.float32:
        hi = tbl.astype(jnp.bfloat16)
        r1 = tbl - hi.astype(jnp.float32)
        mid = r1.astype(jnp.bfloat16)
        lo = (r1 - mid.astype(jnp.float32)).astype(jnp.bfloat16)
        rows = (jnp.dot(onehot, hi, preferred_element_type=jnp.float32)
                + jnp.dot(onehot, mid, preferred_element_type=jnp.float32)
                + jnp.dot(onehot, lo, preferred_element_type=jnp.float32))
    else:
        rows = jnp.dot(onehot.astype(tbl.dtype), tbl,
                       preferred_element_type=jnp.float32)    # (T, D) f32
    out_ref[...] = (rows * scale).astype(out_ref.dtype)


# ---------------------------------------------------------------------------
# Path B: general path.  Table stays in HBM; ids are scalar-prefetched into
# SMEM; T per-row DMA gathers land in an `nbuf`-deep VMEM ring buffer with
# (nbuf - 1)-step lookahead.  Prefetch is issued BEFORE the wait on the
# current slot, and each step does a single full-slot wait.
# ---------------------------------------------------------------------------
def _dma_gather_kernel(ids_ref, emb_hbm, out_ref, buf, sem, *,
                       scale, tile, nbuf, n_steps):
    i = pl.program_id(0)
    lookahead = nbuf - 1

    def start_fetch(step, slot):
        base = step * tile

        def issue(t, carry):
            tok = ids_ref[base + t]
            pltpu.make_async_copy(emb_hbm.at[tok], buf.at[slot, t],
                                  sem.at[slot]).start()
            return carry

        # Descriptor issue is the binding (scalar/misc-slot) work: unroll so
        # SMEM id loads + descriptor construction pack into denser bundles.
        jax.lax.fori_loop(0, tile, issue, 0, unroll=4)

    # Prime the pipeline: the first step issues fetches for steps 0..nbuf-2.
    @pl.when(i == 0)
    def _():
        for d in range(min(lookahead, n_steps)):   # static unrolled priming
            start_fetch(d, d)

    # Issue the lookahead step's fetches BEFORE waiting on the current slot,
    # so descriptor issue + HBM latency overlap with the wait below.
    @pl.when(i + lookahead < n_steps)
    def _():
        start_fetch(i + lookahead, (i + lookahead) % nbuf)

    slot = i % nbuf
    # Single wait covering the whole slot: DMA semaphores count bytes, so one
    # (tile, D)-sized descriptor drains all `tile` row-copy completions.
    pltpu.make_async_copy(buf.at[slot], buf.at[slot], sem.at[slot]).wait()

    out_ref[...] = (buf[slot].astype(jnp.float32) * scale).astype(out_ref.dtype)


def input_embeddings(ids, emb_table, *, tile_tokens=512,
                     force_hbm_gather=False,
                     resident_table_budget=None,
                     onehot_max_vocab=2048,
                     gather_buffers=3,
                     max_prefetch_tokens=32768):
    """ids: (batch, seq) int; emb_table: (vocab, d_model)
    -> (batch, seq, d_model), scaled by sqrt(d_model)."""
    B, S = ids.shape
    vocab, D = emb_table.shape
    n_tok = B * S
    scale = float(math.sqrt(D))
    out_dtype = emb_table.dtype
    itemsize = jnp.dtype(emb_table.dtype).itemsize
    table_bytes = vocab * D * itemsize

    vmem_cap = _vmem_capacity_bytes()
    if resident_table_budget is None:
        # Generation-aware: ~21 MiB on 128 MiB parts (v5e/v6e), ~10 MiB on v7x.
        resident_table_budget = vmem_cap // 6

    # PyTorch nn.Embedding raises on out-of-range ids; here we clamp so the
    # in-kernel gather can never address an out-of-range row.
    flat_ids = jnp.clip(ids.reshape(-1).astype(jnp.int32), 0, vocab - 1)

    def _pick_tile(limit):
        t = max(8, min(int(limit), _round_up(n_tok, 8)))
        return _round_up(t, 8)

    # ---------------- path selection ----------------
    T = _pick_tile(tile_tokens)
    need_a = (2 * table_bytes                 # resident table (double-buffered)
              + 2 * T * D * itemsize          # double-buffered output tile
              + 2 * T * 128 * 4               # id tiles (padded)
              + T * vocab * 2                 # bf16 one-hot intermediate
              + 5 * vocab * D * 4             # hi/mid/lo splits + residuals
              + 2 * T * D * 4)                # f32 row accumulators
    use_resident = ((not force_hbm_gather)
                    and table_bytes <= resident_table_budget
                    and vocab <= onehot_max_vocab
                    and need_a <= int(0.7 * vmem_cap))

    if use_resident:
        n_pad = _round_up(n_tok, T)
        ids2d = flat_ids
        if n_pad != n_tok:
            ids2d = jnp.pad(flat_ids, (0, n_pad - n_tok))
        ids2d = ids2d.reshape(n_pad, 1)
        grid = (n_pad // T,)

        out_flat = pl.pallas_call(
            functools.partial(_onehot_embed_kernel, scale=scale),
            out_shape=jax.ShapeDtypeStruct((n_pad, D), out_dtype),
            grid_spec=pltpu.PrefetchScalarGridSpec(
                num_scalar_prefetch=0,
                grid=grid,
                in_specs=[
                    pl.BlockSpec((T, 1), lambda i: (i, 0)),      # token-id tile
                    pl.BlockSpec((vocab, D), lambda i: (0, 0)),  # resident table
                ],
                out_specs=pl.BlockSpec((T, D), lambda i: (i, 0)),
            ),
            compiler_params=pltpu.CompilerParams(
                dimension_semantics=("parallel",),               # v7x megacore
                vmem_limit_bytes=_vmem_limit_bytes(need_a, vmem_cap)),
        )(ids2d, emb_table)
        return out_flat[:n_tok].reshape(B, S, D)

    # ---------------- path B: HBM DMA gather ----------------
    nbuf = max(2, int(gather_buffers))
    # Clamp the token tile so ring buffer + double-buffered output stay modest
    # (safe on v7x's 64 MiB VMEM); D*itemsize < ~512B rows waste HBM
    # transaction efficiency but remain correct.
    per_tok_bytes = (nbuf + 2) * D * itemsize
    T = _pick_tile(min(tile_tokens, max(8, (24 << 20) // per_tok_bytes)))
    n_pad = _round_up(n_tok, T)
    flat_ids_p = flat_ids
    if n_pad != n_tok:
        flat_ids_p = jnp.pad(flat_ids, (0, n_pad - n_tok))

    # Chunk so the scalar-prefetched id vector stays small in SMEM
    # (1-D SMEM buffers pad to the next power of two of 4*N bytes).
    chunk = max(T, (int(max_prefetch_tokens) // T) * T)

    need_b = nbuf * T * D * itemsize + 2 * T * D * itemsize
    vlim = _vmem_limit_bytes(need_b, vmem_cap)

    # TODO(synk): v7x megacore split for path B (leading size-2 "parallel"
    # grid axis with a per-core prefetch chain); the cross-step prefetch
    # below requires sequential ("arbitrary") traversal of the token axis.
    pieces = []
    for start in range(0, n_pad, chunk):
        stop = min(start + chunk, n_pad)
        ids_c = flat_ids_p[start:stop]
        n_steps = (stop - start) // T
        pieces.append(pl.pallas_call(
            functools.partial(_dma_gather_kernel, scale=scale, tile=T,
                              nbuf=nbuf, n_steps=n_steps),
            out_shape=jax.ShapeDtypeStruct((stop - start, D), out_dtype),
            grid_spec=pltpu.PrefetchScalarGridSpec(
                num_scalar_prefetch=1,                       # ids -> SMEM
                grid=(n_steps,),
                in_specs=[pl.BlockSpec(memory_space=pl.ANY)],  # table in HBM
                out_specs=pl.BlockSpec((T, D), lambda i, ids: (i, 0)),
                scratch_shapes=[
                    pltpu.VMEM((nbuf, T, D), emb_table.dtype),  # gather ring
                    pltpu.SemaphoreType.DMA((nbuf,)),           # per-slot sem
                ],
            ),
            compiler_params=pltpu.CompilerParams(
                dimension_semantics=("arbitrary",),
                vmem_limit_bytes=vlim),
        )(ids_c, emb_table))

    out_flat = pieces[0] if len(pieces) == 1 else jnp.concatenate(pieces, axis=0)
    return out_flat[:n_tok].reshape(B, S, D)


if __name__ == "__main__":
    # Small, deterministic setup consistent with the module's __init__.
    d_model = 128
    vocab_size = 32
    batch, seq = 2, 8

    key = jax.random.PRNGKey(0)
    k_emb, k_ids, k_emb2, k_ids2 = jax.random.split(key, 4)

    # Deterministic "parameters" (nn.Embedding weight ~ N(0, 1) by default).
    emb_table = jax.random.normal(k_emb, (vocab_size, d_model), dtype=jnp.float32)
    ids = jax.random.randint(k_ids, (batch, seq), 0, vocab_size, dtype=jnp.int32)

    out = jax.block_until_ready(input_embeddings(ids, emb_table))
    ref = jnp.take(emb_table, ids, axis=0) * math.sqrt(d_model)
    assert out.shape == (batch, seq, d_model)
    assert jnp.allclose(out, ref, atol=1e-4, rtol=1e-5), "path A (f32) mismatch"

    # Larger config: exercises the resident-table path at a multi-step grid,
    # the bf16-table branch, and the HBM DMA-gather path (forced, multi-tile
    # so the 3-deep prefetch pipeline is actually used).
    v2, d2, b2, s2 = 1024, 256, 4, 128
    emb2 = jax.random.normal(k_emb2, (v2, d2), dtype=jnp.float32)
    ids2 = jax.random.randint(k_ids2, (b2, s2), 0, v2, dtype=jnp.int32)
    ref2 = jnp.take(emb2, ids2, axis=0) * math.sqrt(d2)

    out2a = jax.block_until_ready(input_embeddings(ids2, emb2))
    assert jnp.allclose(out2a, ref2, atol=1e-4, rtol=1e-4), "path A (large) mismatch"

    emb2_bf16 = emb2.astype(jnp.bfloat16)
    ref2_bf16 = jnp.take(emb2_bf16, ids2, axis=0).astype(jnp.float32) * math.sqrt(d2)
    out2c = jax.block_until_ready(input_embeddings(ids2, emb2_bf16))
    assert jnp.allclose(out2c.astype(jnp.float32), ref2_bf16,
                        atol=1e-2, rtol=1e-2), "path A (bf16) mismatch"

    out2b = jax.block_until_ready(
        input_embeddings(ids2, emb2, force_hbm_gather=True, tile_tokens=128))
    assert jnp.allclose(out2b, ref2, atol=1e-5, rtol=1e-5), "path B mismatch"

    print("KERNEL_OK")
</pallas_src>

<mosaic_0001>
module attributes {stable_mosaic.version = 11 : i64} {
  func.func @_onehot_embed_kernel(%arg0: i32, %arg1: memref<16x1xi32, #tpu.memory_space<vmem>>, %arg2: memref<32x128xf32, #tpu.memory_space<vmem>>, %arg3: memref<16x128xf32, #tpu.memory_space<vmem>>) attributes {dimension_semantics = [#tpu.dimension_semantics<parallel>], iteration_bounds = array<i64: 1>, scalar_prefetch = 0 : i64, scratch_operands = 0 : i64, tpu.core_type = #tpu.core_type<tc>, window_params = [{transform_indices = @transform_0, window_bounds = array<i64: 16, 1>}, {pipeline_mode = #tpu.pipeline_mode<synchronous>, transform_indices = @transform_1, window_bounds = array<i64: 32, 128>}, {transform_indices = @transform_2, window_bounds = array<i64: 16, 128>}]} {
    %c0 = arith.constant 0 : index
    %c0_0 = arith.constant 0 : index
    %0 = vector.load %arg1[%c0, %c0_0] : memref<16x1xi32, #tpu.memory_space<vmem>>, vector<16x1xi32>
    %1 = tpu.iota {dimensions = array<i32: 1>} : vector<16x32xi32>
    %2 = vector.broadcast %0 : vector<16x1xi32> to vector<16x32xi32>
    %3 = arith.cmpi eq, %2, %1 : vector<16x32xi32>
    %4 = arith.extui %3 : vector<16x32xi1> to vector<16x32xi32>
    %5 = arith.sitofp %4 : vector<16x32xi32> to vector<16x32xf32>
    %6 = arith.truncf %5 : vector<16x32xf32> to vector<16x32xbf16>
    %c0_1 = arith.constant 0 : index
    %c0_2 = arith.constant 0 : index
    %7 = vector.load %arg2[%c0_1, %c0_2] : memref<32x128xf32, #tpu.memory_space<vmem>>, vector<32x128xf32>
    %8 = arith.truncf %7 : vector<32x128xf32> to vector<32x128xbf16>
    %9 = arith.extf %8 : vector<32x128xbf16> to vector<32x128xf32>
    %10 = arith.subf %7, %9 : vector<32x128xf32>
    %11 = arith.truncf %10 : vector<32x128xf32> to vector<32x128xbf16>
    %12 = arith.extf %11 : vector<32x128xbf16> to vector<32x128xf32>
    %13 = arith.subf %10, %12 : vector<32x128xf32>
    %14 = arith.truncf %13 : vector<32x128xf32> to vector<32x128xbf16>
    %cst = arith.constant dense<0.000000e+00> : vector<16x128xf32>
    %15 = tpu.matmul %6, %8, %cst {dimension_numbers = #tpu.dot_dimension_numbers<[1], [0], [0], [1], [0, 0, 1, 1], [], []>} : vector<16x32xbf16>, vector<32x128xbf16>, vector<16x128xf32> -> vector<16x128xf32>
    %cst_3 = arith.constant dense<0.000000e+00> : vector<16x128xf32>
    %16 = tpu.matmul %6, %11, %cst_3 {dimension_numbers = #tpu.dot_dimension_numbers<[1], [0], [0], [1], [0, 0, 1, 1], [], []>} : vector<16x32xbf16>, vector<32x128xbf16>, vector<16x128xf32> -> vector<16x128xf32>
    %17 = arith.addf %15, %16 : vector<16x128xf32>
    %cst_4 = arith.constant dense<0.000000e+00> : vector<16x128xf32>
    %18 = tpu.matmul %6, %14, %cst_4 {dimension_numbers = #tpu.dot_dimension_numbers<[1], [0], [0], [1], [0, 0, 1, 1], [], []>} : vector<16x32xbf16>, vector<32x128xbf16>, vector<16x128xf32> -> vector<16x128xf32>
    %19 = arith.addf %17, %18 : vector<16x128xf32>
    %cst_5 = arith.constant 11.3137083 : f32
    %20 = vector.broadcast %cst_5 : f32 to vector<16x128xf32>
    %21 = arith.mulf %19, %20 : vector<16x128xf32>
    %c0_6 = arith.constant 0 : index
    %c0_7 = arith.constant 0 : index
    %22 = vector.load %arg3[%c0_6, %c0_7] : memref<16x128xf32, #tpu.memory_space<vmem>>, vector<16x128xf32>
    tpu.vector_store %arg3[%c0_6, %c0_7], %21 {strides = array<i32>} : memref<16x128xf32, #tpu.memory_space<vmem>>, vector<16x128xf32>,
    return
  }
  func.func @transform_0(%arg0: i32) -> (i32, i32) {
    %c0_i32 = arith.constant 0 : i32
    %c0_i32_0 = arith.constant 0 : i32
    return %arg0, %c0_i32 : i32, i32
  }
  func.func @transform_1(%arg0: i32) -> (i32, i32) {
    %c0_i32 = arith.constant 0 : i32
    %c0_i32_0 = arith.constant 0 : i32
    %c0_i32_1 = arith.constant 0 : i32
    return %c0_i32, %c0_i32_0 : i32, i32
  }
  func.func @transform_2(%arg0: i32) -> (i32, i32) {
    %c0_i32 = arith.constant 0 : i32
    %c0_i32_0 = arith.constant 0 : i32
    return %arg0, %c0_i32 : i32, i32
  }
}

</mosaic_0001>

<bundles_post_ra>
// kernel: tpu_custom_call.1
= control target key start
LH: loop header
LB: loop body
LE: loop exit
PB: predicated region body
PF: predicated region fallthrough
CT: control target
= control target key end

     0   :  { %7 = vsyncpa [#allocation3], 0  ;;  %s381_s0 = inlined_call_operand.vmem [shape: s32[16,1], index: 0, kind: input, shape index: {}]   ;;  %s382_s1 = inlined_call_operand.hbm [shape: f32[32,128], index: 1, kind: input, shape index: {}]   ;;  %s383_s2 = inlined_call_operand.hbm [shape: f32[16,128], index: 2, kind: output, shape index: {}]  }
   0x1   :  { %8 = vsyncpa [#allocation4], 0  ;;  %s320_s9 = smov [#allocation2]   ;;  %s272_s13 = scalar_lea.hbm %s382_s1, 512 }
   0x2   :  { %s16_s10 = sshll.u32 %s320_s9, 4  ;;  %p273_p0 = scmp.ne.s32.totalorder %s382_s1, %s272_s13  ;;  %s17_s10 = int_to_ptr.vmem [resolvable:$true] %s16_s10 }
   0x3   :  { %p276_p1 = scmp.lt.u32.totalorder %s272_s13, %s382_s1 }
   0x5   :  { %p278_p2 = pnand %p276_p1, %p273_p0 }
   0x7   :  { %281 = shalt.err (!%p278_p2)
}
   0x8   :  { %s282_s18 = scalar_lea.vmem %s17_s10, 512  ;;  %p287_p4 = scmp.lt.s32.totalorder %s17_s10, %s17_s10 }
   0x9   :  { %p283_p3 = scmp.ne.s32.totalorder %s17_s10, %s282_s18  ;;  %p288_p5 = scmp.lt.s32.totalorder %s282_s18, %s282_s18 }
   0xb   :  { %p289_p6 = por %p288_p5, %p287_p4 }
   0xd   :  { %p290_p7 = pnand %p289_p6, %p283_p3 }
   0xf   :  { %293 = shalt.err (!%p290_p7)
}
  0x10   :  { %s321_s19 = smov 128   ;;  %s322_s20 = smov 8  }
  0x11   :  { %22 = dma.hbm_to_vmem [thread:$0]  %s382_s1, 512, %s17_s10, [#allocation3], %s321_s19, %s321_s19, %s322_s20  }
  0x12   :  { %316 = dma.done.wait [#allocation3], 512  }
  0x13   :  { %317 = vsyncadd [#allocation3], 4294966784  ;;  %v323_v0 = vmov 0   ;;  %v324_v1 = vmov 0.0   ;;  %v27_v2 = vld [vmem:[%s381_s0] sm:$0xff]  ;;  %v45_v4 = vld [vmem:[#allocation2 + $0x8] sm:$0xff]  ;;  %v29_v30 = vlaneseq }
  0x14   :  { %271 = vset.pattern.permute.xlu0 %v323_v0  ;;  %242 = vmatprep.subr.bf16.mxu0 %v324_v1  ;;  %v44_v3 = vld [vmem:[#allocation2] sm:$0xff]  ;;  %v46_v5 = vld [vmem:[#allocation2 + $0x10] sm:$0xff]  ;;  %v47_v6 = vld [vmem:[#allocation2 + $0x18] sm:$0xff]  ;;  %vm325_vm0 = vmmov 0   ;;  %vm70_vm3 = vcmask 261120  }
  0x15   :  { %234 = vmatprep.subr.bf16.mxu1 %v324_v1  ;;  %32 = vperm.xlu0 %271, %v27_v2   ;;  %v28_v7 = vld [vmem:[%s381_s0 + $0x8] sm:$0xff]  ;;  %v48_v8 = vpack.c.bf16 %v45_v4, %v44_v3  ;;  %v49_v9 = vpack.c.bf16 %v47_v6, %v46_v5  ;;  %v30_v31 = vand.u32 127, %v29_v30  ;;  %s326_s0 = smov [#allocation5]  }
  0x16   :  { %238 = vmatprep.mubr.msk.bf16.mxu1 %vm325_vm0, %v324_v1  ;;  %246 = vmatprep.mubr.msk.bf16.mxu0 %vm325_vm0, %v324_v1  ;;  %s208_s1 = sshll.u32 %s326_s0, 4  ;;  %s209_s1 = int_to_ptr.vmem [resolvable:$true] %s208_s1 }
  0x17   :  { %243 = vmatpush3.bf16.msra.mxu0 %v48_v8  ;;  %v50_v10 = vunpack.c.l.bf16 %v48_v8  ;;  %v51_v11 = vunpack.c.h.bf16 %v48_v8  ;;  %v52_v12 = vunpack.c.l.bf16 %v49_v9  ;;  %v53_v13 = vunpack.c.h.bf16 %v49_v9  ;;  %s294_s27 = scalar_lea.vmem %s209_s1, 256  ;;  %p299_p9 = scmp.lt.s32.totalorder %s209_s1, %s209_s1 }
  0x18   :  { %244 = vmatprep.subr.bf16.mxu0 %v324_v1  ;;  %p295_p8 = scmp.ne.s32.totalorder %s209_s1, %s294_s27  ;;  %p300_p10 = scmp.lt.s32.totalorder %s294_s27, %s294_s27 }
  0x19   :  { %35 = vperm.xlu0 %271, %v28_v7   ;;  %v54_v14 = vsub.f32 %v44_v3, %v50_v10  ;;  %v55_v15 = vsub.f32 %v45_v4, %v51_v11  ;;  %v56_v16 = vsub.f32 %v46_v5, %v52_v12  ;;  %v57_v17 = vsub.f32 %v47_v6, %v53_v13 }
  0x1a   :  { %p301_p11 = por %p300_p10, %p299_p9 }
  0x1b   :  { %v58_v18 = vpack.c.bf16 %v55_v15, %v54_v14  ;;  %245 = vmatpush3.bf16.msra.mxu0 %v49_v9  ;;  %v59_v19 = vpack.c.bf16 %v57_v17, %v56_v16 }
  0x1c   :  { %250 = vmatprep.subr.bf16.mxu0 %v324_v1  ;;  %p302_p12 = pnand %p301_p11, %p295_p8 }
  0x1d   :  { %v60_v20 = vunpack.c.l.bf16 %v58_v18  ;;  %v61_v21 = vunpack.c.h.bf16 %v58_v18  ;;  %235 = vmatpush3.bf16.msra.mxu1 %v58_v18  ;;  %v62_v22 = vunpack.c.l.bf16 %v59_v19  ;;  %v63_v23 = vunpack.c.h.bf16 %v59_v19 }
  0x1e   :  { %236 = vmatprep.subr.bf16.mxu1 %v324_v1 }
  0x1f   :  { %v64_v24 = vsub.f32 %v54_v14, %v60_v20  ;;  %v65_v25 = vsub.f32 %v55_v15, %v61_v21  ;;  %v66_v26 = vsub.f32 %v56_v16, %v62_v22  ;;  %v67_v27 = vsub.f32 %v57_v17, %v63_v23 }
  0x21   :  { %237 = vmatpush3.bf16.msra.mxu1 %v59_v19  ;;  %v68_v28 = vpack.c.bf16 %v65_v25, %v64_v24  ;;  %v69_v29 = vpack.c.bf16 %v67_v27, %v66_v26 }
  0x94   :  { %v33_v32 = vpop.permute.xlu0 %32 }
  0x95   :  { %vm37_vm1 = vcmp.eq.s32.totalorder %v33_v32, %v30_v31 }
  0x96   :  { %v220_v34 = vsel %vm37_vm1, 1.0, %v324_v1 }
  0x98   :  { %v36_v33 = vpop.permute.xlu0 %35 }
  0x99   :  { %vm38_vm2 = vcmp.eq.s32.totalorder %v36_v33, %v30_v31 }
  0x9a   :  { %v221_v35 = vsel %vm38_vm2, 1.0, %v324_v1 }
  0x9b   :  { %v43_v36 = vpack.c.bf16 %v221_v35, %v220_v34 }
  0x9d   :  { %239 = vmatmul.mubr.msk.bf16.vlgmr.msra.gmra.mrb[0].mxu1 %vm70_vm3, %v43_v36  ;;  %247 = vmatmul.mubr.msk.bf16.vlgmr.msra.gmra.mrb[0].mxu0 %vm70_vm3, %v43_v36 }
  0x9e   :  { %251 = vmatpush3.bf16.msra.mxu0 %v68_v28  ;;  %254 = vmatprep.mubr.msk.bf16.mxu0 %vm325_vm0, %v324_v1 }
  0x9f   :  { %252 = vmatprep.subr.bf16.mxu0 %v324_v1 }
  0xa2   :  { %253 = vmatpush3.bf16.msra.mxu0 %v69_v29 }
  0xa9   :  { %255 = vmatmul.mubr.msk.bf16.vlgmr.msra.gmra.mrb[0].mxu0 %vm70_vm3, %v43_v36 }
 0x170   :  { %v108_v37 = vpop.f32.mrb[0].mxu1 }
 0x171   :  { %v240_v38 = vpop.f32.mrb[1].mxu1 }
 0x172   :  { %v111_v39 = vpop.f32.mrb[2].mxu1 }
 0x173   :  { %v241_v40 = vpop.f32.mrb[3].mxu1 }
 0x17c   :  { %v190_v41 = vpop.f32.mrb[0].mxu0 }
 0x17d   :  { %v258_v42 = vadd.f32 %v190_v41, %v108_v37  ;;  %v256_v43 = vpop.f32.mrb[1].mxu0 }
 0x17e   :  { %v193_v44 = vpop.f32.mrb[2].mxu0 }
 0x17f   :  { %v199_v45 = vmul.f32 11.313708, %v258_v42  ;;  %v259_v46 = vadd.f32 %v193_v44, %v111_v39  ;;  %v257_v47 = vpop.f32.mrb[3].mxu0 }
 0x181   :  { %201 = vst [vmem:[#allocation5] sm:$0xff] %v199_v45  ;;  %v200_v48 = vmul.f32 11.313708, %v259_v46 }
 0x183   :  { %202 = vst [vmem:[#allocation5 + $0x8] sm:$0xff] %v200_v48 }
 0x184   :  { %305 = shalt.err (!%p302_p12)
}
 0x185   :  { %s306_s30 = scalar_lea.hbm %s383_s2, 256 }
 0x186   :  { %p307_p13 = scmp.ne.s32.totalorder %s383_s2, %s306_s30  ;;  %p310_p0 = scmp.lt.u32.totalorder %s306_s30, %s383_s2 }
 0x188   :  { %p312_p1 = pnand %p310_p0, %p307_p13 }
 0x18a   :  { %315 = shalt.err (!%p312_p1)
}
 0x18b   :  { %214 = dma.vmem_to_hbm [thread:$0]  %s209_s1, 256, %s383_s2, [#allocation4], %s321_s19, %s321_s19, %s322_s20  }
 0x18c   :  { %318 = dma.done.wait [#allocation4], 256  }
 0x18d   :  { %319 = vsyncadd [#allocation4], 4294967040 }
 0x18e   :  { %218 = vsyncpa [#allocation3], 1 }
 0x18f   :  { %219 = vsyncpa [#allocation4], 1 }

</bundles_post_ra>
